<compile_context>
chip_gen: v5e
topology: v5e:2x2
jax: 0.10.0
libtpu: 0.0.40
codegen_flags: <defaults>
</compile_context>

<pallas_src>
import jax
import jax.numpy as jnp
from jax import lax
from jax.experimental import pallas as pl
from jax.experimental.pallas import tpu as pltpu


def _round_up(x: int, m: int) -> int:
    return ((x + m - 1) // m) * m


def _sublane_align(dtype) -> int:
    itemsize = jnp.dtype(dtype).itemsize
    if itemsize >= 4:
        return 8
    if itemsize == 2:
        return 16
    return 32


def _vmem_capacity_bytes() -> int:
    try:
        return int(pltpu.get_tpu_info().vmem_capacity_bytes)
    except Exception:
        # Conservative fallback (v7x per-TensorCore VMEM) so we never over-request.
        return 64 * 1024 * 1024


def _pick_tile(size: int, preferred: int, align: int) -> int:
    """Largest aligned tile <= preferred; prefer exact divisors of `size` to avoid
    padding + post-kernel slice copies."""
    size_r = _round_up(size, align)
    preferred = max(align, (preferred // align) * align)
    if size_r <= preferred:
        return size_r
    t = preferred
    while t > align:
        if size % t == 0:
            return t
        t -= align
    return preferred


# ---------------------------------------------------------------------------
# Kernels
# ---------------------------------------------------------------------------

def _lm_head_kernel_scratch(x_ref, w_ref, b_ref, o_ref, acc_ref):
    """Low-precision output: accumulate in an f32 VMEM scratch, cast on finalize.

    x_ref:   (tm, tk)  activation tile
    w_ref:   (tn, tk)  weight tile in its native (vocab, dim) layout
    b_ref:   (1,  tn)  bias tile (zeros when the head has no bias), f32
    o_ref:   (tm, tn)  logits tile (VMEM-resident across the K axis)
    acc_ref: (tm, tn)  f32 accumulator scratch
    """
    k = pl.program_id(2)

    @pl.when(k == 0)
    def _init():
        acc_ref[...] = jnp.zeros_like(acc_ref)

    acc_ref[...] += lax.dot_general(
        x_ref[...], w_ref[...],
        dimension_numbers=(((1,), (1,)), ((), ())),   # x @ w.T on the MXU
        preferred_element_type=jnp.float32,
    )

    @pl.when(k == pl.num_programs(2) - 1)
    def _finalize():
        o_ref[...] = (acc_ref[...] + b_ref[...]).astype(o_ref.dtype)


def _lm_head_kernel_f32out(x_ref, w_ref, b_ref, o_ref):
    """f32 output: accumulate directly into the VMEM-resident output block
    (no scratch, no finalize copy; bias fused into the init)."""
    k = pl.program_id(2)

    @pl.when(k == 0)
    def _init():
        o_ref[...] = jnp.broadcast_to(b_ref[...], o_ref.shape)

    o_ref[...] += lax.dot_general(
        x_ref[...], w_ref[...],
        dimension_numbers=(((1,), (1,)), ((), ())),
        preferred_element_type=jnp.float32,
    )


# ---------------------------------------------------------------------------
# Wrapper
# ---------------------------------------------------------------------------

def gpt_lm_head_1d(x, weight, bias=None, *, tm=None, tn=None, tk=None,
                   compute_dtype=jnp.bfloat16, out_dtype=None):
    """Forward of GPTLMHead1D: logits = x @ weight.T (+ bias)."""
    B, S, D = x.shape
    V, Dw = weight.shape
    assert D == Dw, "hidden dim mismatch"
    out_dtype = jnp.dtype(x.dtype if out_dtype is None else out_dtype)
    compute_dtype = jnp.dtype(x.dtype if compute_dtype is None else compute_dtype)
    M = B * S

    f32_out = out_dtype == jnp.dtype(jnp.float32)
    isz_c = compute_dtype.itemsize
    isz_o = out_dtype.itemsize
    m_align = max(_sublane_align(compute_dtype), _sublane_align(out_dtype))

    # --- generation-aware tile selection ------------------------------------
    vmem_cap = _vmem_capacity_bytes()
    big_vmem = vmem_cap > 96 * 1024 * 1024            # v5e / v6e (128 MiB) vs v7x (64 MiB)
    tm_pref = (2048 if big_vmem else 1024) if tm is None else tm
    tn_pref = 2048 if tn is None else tn
    tk_pref = 1024 if tk is None else tk

    if tm is None:
        tm = _pick_tile(M, tm_pref, m_align)
    else:
        tm = max(m_align, min(_round_up(tm, m_align), _round_up(M, m_align)))
    if tn is None:
        tn = _pick_tile(V, tn_pref, 128)
    else:
        tn = max(128, min(_round_up(tn, 128), _round_up(V, 128)))
    if tk is None:
        tk = _pick_tile(D, tk_pref, 128)
    else:
        tk = max(128, min(_round_up(tk, 128), _round_up(D, 128)))

    def _footprint(tm_, tn_, tk_):
        fp = 2 * tm_ * tk_ * isz_c          # activations (double buffered)
        fp += 2 * tn_ * tk_ * isz_c         # weight
        fp += 2 * 8 * tn_ * 4               # bias (sublane-padded, f32)
        fp += 2 * tm_ * tn_ * isz_o         # output
        if not f32_out:
            fp += tm_ * tn_ * 4             # f32 accumulator scratch
        return fp

    budget = max(8 * 1024 * 1024, int(vmem_cap * 0.80))
    while _footprint(tm, tn, tk) > budget:
        if tn > 512:
            tn = _round_up(tn // 2, 128)
        elif tk > 256:
            tk = _round_up(tk // 2, 128)
        elif tm > 2 * m_align:
            tm = _round_up(tm // 2, m_align)
        elif tn > 128:
            tn = _round_up(tn // 2, 128)
        elif tk > 128:
            tk = _round_up(tk // 2, 128)
        else:
            break

    Mp = _round_up(M, tm)
    Vp = _round_up(V, tn)
    Kp = _round_up(D, tk)

    # --- operand prep (no weight transpose; keep native (V, D) layout) ------
    x2 = x.reshape(M, D).astype(compute_dtype)
    if (Mp, Kp) != (M, D):
        x2 = jnp.pad(x2, ((0, Mp - M), (0, Kp - D)))
    w2 = weight.astype(compute_dtype)
    if (Vp, Kp) != (V, D):
        w2 = jnp.pad(w2, ((0, Vp - V), (0, Kp - D)))
    if bias is None:
        b2 = jnp.zeros((1, Vp), dtype=jnp.float32)
    else:
        b2 = bias.reshape(1, V).astype(jnp.float32)
        if Vp != V:
            b2 = jnp.pad(b2, ((0, 0), (0, Vp - V)))

    # Vocab leading so megacore splits the weight stream, not the activations.
    grid = (Vp // tn, Mp // tm, Kp // tk)

    footprint = _footprint(tm, tn, tk)
    vmem_limit = int(min(max(footprint + footprint // 4 + (8 << 20), 32 << 20),
                         int(vmem_cap * 0.85)))

    bytes_accessed = int(
        (Mp // tm) * Vp * Kp * isz_c      # weight re-streamed once per token-tile pass
        + (Vp // tn) * Mp * Kp * isz_c    # activations re-streamed once per vocab-tile pass
        + Mp * Vp * isz_o                 # logits written once
        + Vp * 4                          # bias
    )
    cost = pl.CostEstimate(
        flops=2 * M * V * D, transcendentals=0, bytes_accessed=bytes_accessed
    )

    kernel = _lm_head_kernel_f32out if f32_out else _lm_head_kernel_scratch
    scratch = [] if f32_out else [pltpu.VMEM((tm, tn), jnp.float32)]

    out = pl.pallas_call(
        kernel,
        out_shape=jax.ShapeDtypeStruct((Mp, Vp), out_dtype),
        grid_spec=pltpu.PrefetchScalarGridSpec(
            num_scalar_prefetch=0,
            grid=grid,
            in_specs=[
                pl.BlockSpec((tm, tk), lambda j, i, k: (i, k)),  # activations
                pl.BlockSpec((tn, tk), lambda j, i, k: (j, k)),  # weight (vocab, dim)
                pl.BlockSpec((1, tn), lambda j, i, k: (0, j)),   # bias (f32)
            ],
            out_specs=pl.BlockSpec((tm, tn), lambda j, i, k: (i, j)),
            scratch_shapes=scratch,
        ),
        compiler_params=pltpu.CompilerParams(
            dimension_semantics=("parallel", "parallel", "arbitrary"),
            vmem_limit_bytes=vmem_limit,
        ),
        cost_estimate=cost,
    )(x2, w2, b2)

    if (Mp, Vp) != (M, V):
        out = out[:M, :V]
    return out.reshape(B, S, V)


if __name__ == "__main__":
    # Small shapes consistent with the module's forward: (batch, seq, dim) -> (batch, seq, vocab)
    B, S, D, V = 2, 8, 32, 256

    key = jax.random.PRNGKey(0)
    kx, kw, krest = jax.random.split(key, 3)
    x = jax.random.normal(kx, (B, S, D), dtype=jnp.float32)
    # Deterministic synthetic tied word-embedding / classifier weight, shape (vocab, dim)
    weight = jax.random.normal(kw, (V, D), dtype=jnp.float32) * (1.0 / jnp.sqrt(D))

    # f32 compute + f32 output path: direct accumulation into the output block.
    logits = gpt_lm_head_1d(x, weight, compute_dtype=jnp.float32)  # bias=False default
    logits = jax.block_until_ready(logits)

    ref = jnp.einsum("bsd,vd->bsv", x, weight)
    assert logits.shape == (B, S, V)
    assert jnp.allclose(logits, ref, atol=1e-4, rtol=1e-4)

    # Second check: bf16 compute path, non-aligned shapes + bias + multi-tile grid —
    # exercises M/V/K padding, the K-axis f32 scratch accumulator, and fused bias.
    B2, S2, D2, V2 = 2, 50, 200, 1000
    kx2, kw2, kb2 = jax.random.split(krest, 3)
    x_b = jax.random.normal(kx2, (B2, S2, D2), dtype=jnp.float32)
    w_b = jax.random.normal(kw2, (V2, D2), dtype=jnp.float32) * (1.0 / jnp.sqrt(D2))
    b_b = jax.random.normal(kb2, (V2,), dtype=jnp.float32)

    out_b = gpt_lm_head_1d(x_b, w_b, b_b, tm=64, tn=256, tk=128,
                           compute_dtype=jnp.bfloat16, out_dtype=jnp.bfloat16)
    out_b = jax.block_until_ready(out_b)

    ref_b = (jnp.einsum("bsd,vd->bsv",
                        x_b.astype(jnp.bfloat16), w_b.astype(jnp.bfloat16),
                        preferred_element_type=jnp.float32)
             + b_b[None, None, :]).astype(jnp.bfloat16)
    assert out_b.shape == (B2, S2, V2)
    assert jnp.allclose(out_b.astype(jnp.float32), ref_b.astype(jnp.float32),
                        atol=5e-2, rtol=5e-2)

    print("KERNEL_OK")
</pallas_src>

<mosaic_0001>
module attributes {stable_mosaic.version = 11 : i64} {
  func.func @_lm_head_kernel_f32out(%arg0: i32, %arg1: i32, %arg2: i32, %arg3: memref<16x128xf32, #tpu.memory_space<vmem>>, %arg4: memref<256x128xf32, #tpu.memory_space<vmem>>, %arg5: memref<1x256xf32, #tpu.memory_space<vmem>>, %arg6: memref<16x256xf32, #tpu.memory_space<vmem>>) attributes {dimension_semantics = [#tpu.dimension_semantics<parallel>, #tpu.dimension_semantics<parallel>, #tpu.dimension_semantics<arbitrary>], iteration_bounds = array<i64: 1, 1, 1>, scalar_prefetch = 0 : i64, scratch_operands = 0 : i64, tpu.core_type = #tpu.core_type<tc>, window_params = [{transform_indices = @transform_0, window_bounds = array<i64: 16, 128>}, {transform_indices = @transform_1, window_bounds = array<i64: 256, 128>}, {transform_indices = @transform_2, window_bounds = array<i64: 1, 256>}, {transform_indices = @transform_3, window_bounds = array<i64: 16, 256>}]} {
    %c0_i32 = arith.constant 0 : i32
    %0 = arith.cmpi eq, %arg2, %c0_i32 : i32
    %1 = arith.extui %0 : i1 to i32
    %c0_i32_0 = arith.constant 0 : i32
    %2 = arith.cmpi ne, %1, %c0_i32_0 : i32
    scf.if %2 {
      %c0_8 = arith.constant 0 : index
      %c0_9 = arith.constant 0 : index
      %9 = vector.load %arg5[%c0_8, %c0_9] : memref<1x256xf32, #tpu.memory_space<vmem>>, vector<1x256xf32>
      %10 = vector.shape_cast %9 : vector<1x256xf32> to vector<1x256xf32>
      %11 = vector.broadcast %10 : vector<1x256xf32> to vector<16x256xf32>
      %c0_10 = arith.constant 0 : index
      %c0_11 = arith.constant 0 : index
      %12 = vector.load %arg6[%c0_10, %c0_11] : memref<16x256xf32, #tpu.memory_space<vmem>>, vector<16x256xf32>
      tpu.vector_store %arg6[%c0_10, %c0_11], %11 {strides = array<i32>} : memref<16x256xf32, #tpu.memory_space<vmem>>, vector<16x256xf32>,
    } else {
    }
    %c0 = arith.constant 0 : index
    %c0_1 = arith.constant 0 : index
    %3 = vector.load %arg6[%c0, %c0_1] : memref<16x256xf32, #tpu.memory_space<vmem>>, vector<16x256xf32>
    %c0_2 = arith.constant 0 : index
    %c0_3 = arith.constant 0 : index
    %4 = vector.load %arg3[%c0_2, %c0_3] : memref<16x128xf32, #tpu.memory_space<vmem>>, vector<16x128xf32>
    %c0_4 = arith.constant 0 : index
    %c0_5 = arith.constant 0 : index
    %5 = vector.load %arg4[%c0_4, %c0_5] : memref<256x128xf32, #tpu.memory_space<vmem>>, vector<256x128xf32>
    %cst = arith.constant dense<0.000000e+00> : vector<16x256xf32>
    %6 = tpu.matmul %4, %5, %cst {dimension_numbers = #tpu.dot_dimension_numbers<[1], [1], [0], [0], [0, 0, 1, 0], [], []>} : vector<16x128xf32>, vector<256x128xf32>, vector<16x256xf32> -> vector<16x256xf32>
    %7 = arith.addf %3, %6 : vector<16x256xf32>
    %c0_6 = arith.constant 0 : index
    %c0_7 = arith.constant 0 : index
    %8 = vector.load %arg6[%c0_6, %c0_7] : memref<16x256xf32, #tpu.memory_space<vmem>>, vector<16x256xf32>
    tpu.vector_store %arg6[%c0_6, %c0_7], %7 {strides = array<i32>} : memref<16x256xf32, #tpu.memory_space<vmem>>, vector<16x256xf32>,
    return
  }
  func.func @transform_0(%arg0: i32, %arg1: i32, %arg2: i32) -> (i32, i32) {
    %c0_i32 = arith.constant 0 : i32
    return %arg1, %arg2 : i32, i32
  }
  func.func @transform_1(%arg0: i32, %arg1: i32, %arg2: i32) -> (i32, i32) {
    %c0_i32 = arith.constant 0 : i32
    return %arg0, %arg2 : i32, i32
  }
  func.func @transform_2(%arg0: i32, %arg1: i32, %arg2: i32) -> (i32, i32) {
    %c0_i32 = arith.constant 0 : i32
    %c0_i32_0 = arith.constant 0 : i32
    return %c0_i32, %arg0 : i32, i32
  }
  func.func @transform_3(%arg0: i32, %arg1: i32, %arg2: i32) -> (i32, i32) {
    %c0_i32 = arith.constant 0 : i32
    return %arg1, %arg0 : i32, i32
  }
}

</mosaic_0001>

<bundles_post_ra>
// kernel: tpu_custom_call.1
= control target key start
LH: loop header
LB: loop body
LE: loop exit
PB: predicated region body
PF: predicated region fallthrough
CT: control target
= control target key end

     0   :  { %8 = vsyncpa [#allocation3], 0  ;;  %s368_s0 = inlined_call_operand.hbm [shape: f32[16,128], index: 0, kind: input, shape index: {}]   ;;  %s369_s1 = inlined_call_operand.hbm [shape: f32[256,128], index: 1, kind: input, shape index: {}]   ;;  %s370_s2 = inlined_call_operand.hbm [shape: f32[1,256], index: 2, kind: input, shape index: {}]   ;;  %s371_s3 = inlined_call_operand.hbm [shape: f32[16,256], index: 3, kind: output, shape index: {}]  }
   0x1   :  { %9 = vsyncpa [#allocation6], 0 }
   0x2   :  { %10 = vsyncpa [#allocation4], 0  ;;  %s28_s14 = sshll.u32 %s369_s1, 4  ;;  %s328_s15 = smov [#allocation5]   ;;  %s29_s14 = int_to_ptr.hbm [resolvable:$true] %s28_s14 }
   0x3   :  { %s30_s16 = sshll.u32 %s328_s15, 4  ;;  %s15_s19 = sshll.u32 %s368_s0, 4  ;;  %s31_s16 = int_to_ptr.vmem [resolvable:$true] %s30_s16  ;;  %s16_s19 = int_to_ptr.hbm [resolvable:$true] %s15_s19 }
   0x4   :  { %s329_s20 = smov 128   ;;  %s330_s21 = smov 8  }
   0x5   :  { %36 = dma.hbm_to_vmem [thread:$0]  %s29_s14, 4096, %s31_s16, [#allocation6], %s329_s20, %s329_s20, %s330_s21  }
   0x6   :  { %s331_s22 = smov [#allocation2]   ;;  %s42_s26 = sshll.u32 %s370_s2, 4  ;;  %s43_s26 = int_to_ptr.hbm [resolvable:$true] %s42_s26 }
   0x7   :  { %s17_s23 = sshll.u32 %s331_s22, 4  ;;  %s332_s1 = smov [#allocation7]   ;;  %s18_s23 = int_to_ptr.vmem [resolvable:$true] %s17_s23 }
   0x8   :  { %23 = dma.hbm_to_vmem [thread:$0]  %s16_s19, 256, %s18_s23, [#allocation3], %s329_s20, %s329_s20, %s330_s21  }
   0x9   :  { %s44_s27 = sshll.u32 %s332_s1, 4  ;;  %s45_s27 = int_to_ptr.vmem [resolvable:$true] %s44_s27 }
   0xa   :  { %47 = dma.hbm_to_vmem [thread:$0]  %s43_s26, 32, %s45_s27, [#allocation6]  }
   0xb   :  { %322 = dma.done.wait [#allocation3], 256  }
   0xc   :  { %323 = vsyncadd [#allocation3], 4294967040 }
   0xd   :  { %324 = dma.done.wait [#allocation6], 4128  }
   0xe   :  { %325 = vsyncadd [#allocation6], 4294963168  ;;  %v95_v0 = vld [vmem:[#allocation5 + $0x78] sm:$0xff]  ;;  %v94_v2 = vld [vmem:[#allocation5 + $0x70] sm:$0xff]  ;;  %s333_s0 = smov [#allocation8]   ;;  %s172_s30 = sshll.u32 %s371_s3, 4  ;;  %s173_s30 = int_to_ptr.hbm [resolvable:$true] %s172_s30 }
   0xf   :  { %v111_v1 = vld [vmem:[#allocation5 + $0xf8] sm:$0xff]  ;;  %186 = vmatpush.xpose.msra.mxu2 %v95_v0  ;;  %v110_v3 = vld [vmem:[#allocation5 + $0xf0] sm:$0xff]  ;;  %112 = vmatpush.xpose.msra.mxu0 %v95_v0  ;;  %v93_v4 = vld [vmem:[#allocation5 + $0x68] sm:$0xff]  ;;  %s170_s2 = sshll.u32 %s333_s0, 4  ;;  %s334_s4 = smov 256   ;;  %s171_s2 = int_to_ptr.vmem [resolvable:$true] %s170_s2 }
  0x10   :  { %202 = vmatpush.xpose.msra.mxu3 %v111_v1  ;;  %135 = vmatpush.xpose.msra.mxu1 %v111_v1  ;;  %v109_v5 = vld [vmem:[#allocation5 + $0xe8] sm:$0xff]  ;;  %v92_v6 = vld [vmem:[#allocation5 + $0x60] sm:$0xff]  ;;  %v91_v8 = vld [vmem:[#allocation5 + $0x58] sm:$0xff]  ;;  %s335_s5 = smov 16  }
  0x11   :  { %v108_v7 = vld [vmem:[#allocation5 + $0xe0] sm:$0xff]  ;;  %v107_v9 = vld [vmem:[#allocation5 + $0xd8] sm:$0xff]  ;;  %v90_v10 = vld [vmem:[#allocation5 + $0x50] sm:$0xff] }
  0x12   :  { %v106_v11 = vld [vmem:[#allocation5 + $0xd0] sm:$0xff]  ;;  %v89_v12 = vld [vmem:[#allocation5 + $0x48] sm:$0xff]  ;;  %v88_v14 = vld [vmem:[#allocation5 + $0x40] sm:$0xff] }
  0x13   :  { %187 = vmatpush.xpose.msra.mxu2 %v94_v2  ;;  %113 = vmatpush.xpose.msra.mxu0 %v94_v2  ;;  %v105_v13 = vld [vmem:[#allocation5 + $0xc8] sm:$0xff]  ;;  %v104_v15 = vld [vmem:[#allocation5 + $0xc0] sm:$0xff]  ;;  %v87_v16 = vld [vmem:[#allocation5 + $0x38] sm:$0xff] }
  0x14   :  { %203 = vmatpush.xpose.msra.mxu3 %v110_v3  ;;  %136 = vmatpush.xpose.msra.mxu1 %v110_v3  ;;  %v103_v17 = vld [vmem:[#allocation5 + $0xb8] sm:$0xff]  ;;  %v86_v18 = vld [vmem:[#allocation5 + $0x30] sm:$0xff]  ;;  %v85_v20 = vld [vmem:[#allocation5 + $0x28] sm:$0xff] }
  0x15   :  { %v102_v19 = vld [vmem:[#allocation5 + $0xb0] sm:$0xff]  ;;  %v101_v21 = vld [vmem:[#allocation5 + $0xa8] sm:$0xff]  ;;  %v84_v22 = vld [vmem:[#allocation5 + $0x20] sm:$0xff] }
  0x16   :  { %v100_v23 = vld [vmem:[#allocation5 + $0xa0] sm:$0xff]  ;;  %v83_v24 = vld [vmem:[#allocation5 + $0x18] sm:$0xff]  ;;  %v82_v26 = vld [vmem:[#allocation5 + $0x10] sm:$0xff] }
  0x17   :  { %188 = vmatpush.xpose.msra.mxu2 %v93_v4  ;;  %114 = vmatpush.xpose.msra.mxu0 %v93_v4  ;;  %v99_v25 = vld [vmem:[#allocation5 + $0x98] sm:$0xff]  ;;  %v98_v27 = vld [vmem:[#allocation5 + $0x90] sm:$0xff]  ;;  %v81_v28 = vld [vmem:[#allocation5 + $0x8] sm:$0xff] }
  0x18   :  { %204 = vmatpush.xpose.msra.mxu3 %v109_v5  ;;  %137 = vmatpush.xpose.msra.mxu1 %v109_v5  ;;  %v97_v29 = vld [vmem:[#allocation5 + $0x88] sm:$0xff]  ;;  %v80_v30 = vld [vmem:[#allocation5] sm:$0xff]  ;;  %v79_v32 = vld [vmem:[#allocation2 + $0x8] sm:$0xff] }
  0x19   :  { %v96_v31 = vld [vmem:[#allocation5 + $0x80] sm:$0xff]  ;;  %v78_v33 = vld [vmem:[#allocation2] sm:$0xff] }
  0x1a   :  { %v64_v34 = vld [vmem:[#allocation7] sm:$0x3] }
  0x1b   :  { %189 = vmatpush.xpose.msra.mxu2 %v92_v6  ;;  %115 = vmatpush.xpose.msra.mxu0 %v92_v6  ;;  %v66_v35 = vperm.slane %v64_v34, 0  ;;  %v67_v36 = vperm.slane %v64_v34, 1 }
  0x1c   :  { %205 = vmatpush.xpose.msra.mxu3 %v108_v7  ;;  %138 = vmatpush.xpose.msra.mxu1 %v108_v7 }
  0x1f   :  { %190 = vmatpush.xpose.msra.mxu2 %v91_v8  ;;  %116 = vmatpush.xpose.msra.mxu0 %v91_v8 }
  0x20   :  { %206 = vmatpush.xpose.msra.mxu3 %v107_v9  ;;  %139 = vmatpush.xpose.msra.mxu1 %v107_v9 }
  0x23   :  { %191 = vmatpush.xpose.msra.mxu2 %v90_v10  ;;  %117 = vmatpush.xpose.msra.mxu0 %v90_v10 }
  0x24   :  { %207 = vmatpush.xpose.msra.mxu3 %v106_v11  ;;  %140 = vmatpush.xpose.msra.mxu1 %v106_v11 }
  0x27   :  { %192 = vmatpush.xpose.msra.mxu2 %v89_v12  ;;  %118 = vmatpush.xpose.msra.mxu0 %v89_v12 }
  0x28   :  { %208 = vmatpush.xpose.msra.mxu3 %v105_v13  ;;  %141 = vmatpush.xpose.msra.mxu1 %v105_v13 }
  0x2b   :  { %193 = vmatpush.xpose.msra.mxu2 %v88_v14  ;;  %119 = vmatpush.xpose.msra.mxu0 %v88_v14 }
  0x2c   :  { %209 = vmatpush.xpose.msra.mxu3 %v104_v15  ;;  %142 = vmatpush.xpose.msra.mxu1 %v104_v15 }
  0x2f   :  { %194 = vmatpush.xpose.msra.mxu2 %v87_v16  ;;  %120 = vmatpush.xpose.msra.mxu0 %v87_v16 }
  0x30   :  { %210 = vmatpush.xpose.msra.mxu3 %v103_v17  ;;  %143 = vmatpush.xpose.msra.mxu1 %v103_v17 }
  0x33   :  { %195 = vmatpush.xpose.msra.mxu2 %v86_v18  ;;  %121 = vmatpush.xpose.msra.mxu0 %v86_v18 }
  0x34   :  { %211 = vmatpush.xpose.msra.mxu3 %v102_v19  ;;  %144 = vmatpush.xpose.msra.mxu1 %v102_v19 }
  0x37   :  { %196 = vmatpush.xpose.msra.mxu2 %v85_v20  ;;  %122 = vmatpush.xpose.msra.mxu0 %v85_v20 }
  0x38   :  { %212 = vmatpush.xpose.msra.mxu3 %v101_v21  ;;  %145 = vmatpush.xpose.msra.mxu1 %v101_v21 }
  0x3b   :  { %197 = vmatpush.xpose.msra.mxu2 %v84_v22  ;;  %123 = vmatpush.xpose.msra.mxu0 %v84_v22 }
  0x3c   :  { %213 = vmatpush.xpose.msra.mxu3 %v100_v23  ;;  %146 = vmatpush.xpose.msra.mxu1 %v100_v23 }
  0x3f   :  { %198 = vmatpush.xpose.msra.mxu2 %v83_v24  ;;  %124 = vmatpush.xpose.msra.mxu0 %v83_v24 }
  0x40   :  { %214 = vmatpush.xpose.msra.mxu3 %v99_v25  ;;  %147 = vmatpush.xpose.msra.mxu1 %v99_v25 }
  0x43   :  { %199 = vmatpush.xpose.msra.mxu2 %v82_v26  ;;  %125 = vmatpush.xpose.msra.mxu0 %v82_v26 }
  0x44   :  { %215 = vmatpush.xpose.msra.mxu3 %v98_v27  ;;  %148 = vmatpush.xpose.msra.mxu1 %v98_v27 }
  0x47   :  { %200 = vmatpush.xpose.msra.mxu2 %v81_v28  ;;  %126 = vmatpush.xpose.msra.mxu0 %v81_v28 }
  0x48   :  { %216 = vmatpush.xpose.msra.mxu3 %v97_v29  ;;  %149 = vmatpush.xpose.msra.mxu1 %v97_v29 }
  0x4b   :  { %201 = vmatpush.xpose.msra.mxu2 %v80_v30  ;;  %127 = vmatpush.xpose.msra.mxu0 %v80_v30 }
  0x4c   :  { %217 = vmatpush.xpose.msra.mxu3 %v96_v31  ;;  %150 = vmatpush.xpose.msra.mxu1 %v96_v31 }
  0x4e   :  { %131 = vmatmul.f32.vlgmr.msra.gmra.mxu2 %v79_v32  ;;  %128 = vmatmul.f32.vlgmr.msra.gmra.mxu0 %v78_v33 }
  0x4f   :  { %154 = vmatmul.f32.vlgmr.msra.gmra.mxu3 %v79_v32  ;;  %151 = vmatmul.f32.vlgmr.msra.gmra.mxu1 %v78_v33 }
  0xcb   :  { %v129_v37 = vpop.f32.mrf.mxu0 }
  0xcc   :  { %v152_v38 = vpop.f32.mrf.mxu1  ;;  %v158_v39 = vadd.f32 %v129_v37, %v66_v35 }
  0xcd   :  { %v159_v40 = vadd.f32 %v152_v38, %v67_v36 }
  0xce   :  { %162 = vst [vmem:[#allocation8] sm:$0xff] %v158_v39 }
  0xcf   :  { %163 = vst [vmem:[#allocation8 + $0x8] sm:$0xff] %v159_v40 }
  0xd1   :  { %v132_v41 = vpop.f32.mrf.mxu2 }
  0xd2   :  { %v155_v42 = vpop.f32.mrf.mxu3  ;;  %v160_v43 = vadd.f32 %v132_v41, %v66_v35 }
  0xd3   :  { %v161_v44 = vadd.f32 %v155_v42, %v67_v36 }
  0xd4   :  { %164 = vst [vmem:[#allocation8 + $0x10] sm:$0xff] %v160_v43 }
  0xd5   :  { %165 = vst [vmem:[#allocation8 + $0x18] sm:$0xff] %v161_v44 }
  0xd6   :  { %178 = dma.vmem_to_hbm [thread:$0]  %s171_s2, 512, %s173_s30, [#allocation4], %s334_s4, %s334_s4, %s335_s5  }
  0xd7   :  { %326 = dma.done.wait [#allocation4], 512  }
  0xd8   :  { %327 = vsyncadd [#allocation4], 4294966784 }
  0xd9   :  { %183 = vsyncpa [#allocation3], 1 }
  0xda   :  { %184 = vsyncpa [#allocation6], 1 }
  0xdb   :  { %185 = vsyncpa [#allocation4], 1 }

</bundles_post_ra>
